<compile_context>
chip_gen: v6e
topology: v6e:2x2x1
jax: 0.10.0
libtpu: 0.0.40
codegen_flags: <defaults>
</compile_context>

<pallas_src>
import functools

import jax
import jax.numpy as jnp
from jax.experimental import pallas as pl
from jax.experimental.pallas import tpu as pltpu


def _round_up(n, m):
    return ((n + m - 1) // m) * m


def _cdiv(a, b):
    return -(-a // b)


def _tpu_generation():
    """Best-effort TPU generation (4, 5, 6, 7, ...); defaults to 6 if unknown."""
    try:
        kind = jax.devices()[0].device_kind
    except Exception:
        return 6
    digits = [int(c) for c in kind if c.isdigit()]
    return digits[0] if digits else 6


def _mlp_kernel(x_ref, w1_ref, w23_ref, b_ref, o_ref):
    """Fused fc1 -> tanh -> fc2 -> tanh -> fc3 -> tanh on one lane-densified batch tile."""
    cdt = w1_ref.dtype  # matmul operand dtype (bf16 or f32); accumulation is always f32
    h = jnp.dot(x_ref[...].astype(cdt), w1_ref[...], preferred_element_type=jnp.float32)
    h = jnp.tanh(h + b_ref[0])
    h = jnp.dot(h.astype(cdt), w23_ref[0], preferred_element_type=jnp.float32)
    h = jnp.tanh(h + b_ref[1])
    h = jnp.dot(h.astype(cdt), w23_ref[1], preferred_element_type=jnp.float32)
    o_ref[...] = jnp.tanh(h + b_ref[2]).astype(o_ref.dtype)


def _pack_params(params, pack, matmul_dtype):
    """Block-diagonal weight packing + bias tiling for lane densification."""
    def bdiag(w):
        i_f, o_f = w.shape
        eye = jnp.eye(pack, dtype=w.dtype)
        # Wp[p*i_f + i, q*o_f + o] = delta(p,q) * w[i, o]
        return jnp.einsum("pq,io->piqo", eye, w).reshape(pack * i_f, pack * o_f)

    def btile(b):
        return jnp.tile(b.reshape(1, -1), (1, pack))

    w1 = bdiag(params["w1"]).astype(matmul_dtype)
    w23 = jnp.stack([bdiag(params["w2"]), bdiag(params["w3"])]).astype(matmul_dtype)
    b = jnp.stack([btile(params["b1"]), btile(params["b2"]), btile(params["b3"])])
    return w1, w23, b.astype(jnp.float32)


@functools.partial(
    jax.jit, static_argnames=("block_b", "pack", "min_grid_steps", "matmul_dtype"))
def _forward_impl(x, params, block_b, pack, min_grid_steps, matmul_dtype):
    B, in_dim = x.shape
    emb = params["w1"].shape[1]
    din_p = in_dim * pack
    dp = emb * pack

    w1, w23, b = _pack_params(params, pack, matmul_dtype)

    # Pad batch only up to a multiple of the packing factor (copy only for ragged B).
    B_pad = _round_up(B, pack)
    if B_pad != B:
        x = jnp.pad(x, ((0, B_pad - B), (0, 0)))
    rows = B_pad // pack
    # Free row-major reshape: (B_pad, 32) f32 -> (B_pad/pack, 32*pack).
    xd = x.reshape(rows, din_p)

    # Batch tile (in dense rows). A ragged last grid block is handled by Mosaic's masked
    # out-of-bounds writeback, so we never pad the whole array to a tile multiple.
    blk_target = max(8, _round_up(max(block_b // pack, 1), 8))
    blk = rows if rows <= blk_target else blk_target
    grid_n = _cdiv(rows, blk)
    if min_grid_steps >= 2 and grid_n < 2 and rows >= 16:
        # v7x: guarantee >= 2 grid steps so both TensorCores get work.
        blk = _round_up(_cdiv(rows, 2), 8)
        grid_n = _cdiv(rows, blk)

    # VMEM budget: double-buffered x/out tiles + resident weights + intermediates.
    itemsz = jnp.dtype(matmul_dtype).itemsize
    x_bytes = blk * din_p * 4
    o_bytes = blk * dp * 4
    w_bytes = (din_p * dp + 2 * dp * dp) * itemsz + 3 * dp * 4
    h_bytes = blk * dp * (4 + itemsz)
    footprint = 2 * (x_bytes + o_bytes + w_bytes) + 3 * h_bytes
    vmem_limit = int(min(max(2 * footprint, 12 * 1024 * 1024), 30 * 1024 * 1024))

    in_specs = [
        pl.BlockSpec((blk, din_p), lambda i: (i, 0)),     # x           : tiled over batch
        pl.BlockSpec((din_p, dp), lambda i: (0, 0)),      # w1 (packed) : resident
        pl.BlockSpec((2, dp, dp), lambda i: (0, 0, 0)),   # w2,w3 stack : resident
        pl.BlockSpec((3, 1, dp), lambda i: (0, 0, 0)),    # b1,b2,b3 stack
    ]
    out_spec = pl.BlockSpec((blk, dp), lambda i: (i, 0))

    out = pl.pallas_call(
        _mlp_kernel,
        out_shape=jax.ShapeDtypeStruct((rows, dp), x.dtype),
        grid_spec=pltpu.PrefetchScalarGridSpec(
            num_scalar_prefetch=0,
            grid=(grid_n,),
            in_specs=in_specs,
            out_specs=out_spec,
        ),
        compiler_params=pltpu.CompilerParams(
            dimension_semantics=("parallel",),
            vmem_limit_bytes=vmem_limit,
        ),
    )(xd, w1, w23, b)

    return out.reshape(B_pad, emb)[:B]


def numerical_embedding_forward(x, params, block_b=8192, matmul_dtype=jnp.bfloat16,
                                pack=None, min_grid_steps=None):
    """x: (B, 32) float32. params: dict w1,b1,w2,b2,w3,b3 with weights stored (in, out)."""
    gen = _tpu_generation()
    if pack is None:
        pack = 4 if gen <= 5 else 8           # 128-wide MXU (v5e) vs 256-wide (v6e/v7x)
    if min_grid_steps is None:
        min_grid_steps = 2 if gen >= 7 else 1  # v7x has 2 TensorCores per chip
    return _forward_impl(x, params, block_b, pack, min_grid_steps, matmul_dtype)


def init_params(key, embedding_size, in_features=32, dtype=jnp.float32):
    """Deterministic init matching nn.Linear's U(-1/sqrt(fan_in), 1/sqrt(fan_in))."""
    def linear(k, fan_in, fan_out):
        kw, kb = jax.random.split(k)
        bound = 1.0 / jnp.sqrt(fan_in)
        # stored as (in, out) == transpose of PyTorch's (out, in)
        w = jax.random.uniform(kw, (fan_in, fan_out), dtype, -bound, bound)
        b = jax.random.uniform(kb, (1, fan_out), dtype, -bound, bound)
        return w, b

    k1, k2, k3 = jax.random.split(key, 3)
    w1, b1 = linear(k1, in_features, embedding_size)
    w2, b2 = linear(k2, embedding_size, embedding_size)
    w3, b3 = linear(k3, embedding_size, embedding_size)
    return {"w1": w1, "b1": b1, "w2": w2, "b2": b2, "w3": w3, "b3": b3}


def reference_forward(x, params, matmul_dtype=jnp.float32):
    """Pure-JAX reference of the PyTorch forward pass (optionally bf16 matmul operands)."""
    def lin(h, w, b):
        return jnp.dot(h.astype(matmul_dtype), w.astype(matmul_dtype),
                       preferred_element_type=jnp.float32) + b
    h = jnp.tanh(lin(x, params["w1"], params["b1"]))
    h = jnp.tanh(lin(h, params["w2"], params["b2"]))
    return jnp.tanh(lin(h, params["w3"], params["b3"]))


if __name__ == "__main__":
    key = jax.random.PRNGKey(0)
    k_param, k_x1, k_x2 = jax.random.split(key, 3)

    embedding_size = 32
    in_features = 32  # fixed by the module: nn.Linear(32, embedding_size)
    params = init_params(k_param, embedding_size, in_features)

    # Case 1: small ragged batch (B not a multiple of the packing factor -> pad path).
    x1 = jax.random.normal(k_x1, (10, in_features), dtype=jnp.float32)
    out1 = jax.block_until_ready(numerical_embedding_forward(x1, params))
    assert out1.shape == (10, embedding_size)
    ref1_bf16 = reference_forward(x1, params, matmul_dtype=jnp.bfloat16)
    ref1_f32 = reference_forward(x1, params)
    assert jnp.allclose(out1, ref1_bf16, atol=2e-3, rtol=2e-3), "case 1 vs bf16 ref"
    assert jnp.allclose(out1, ref1_f32, atol=5e-2, rtol=5e-2), "case 1 vs f32 ref"

    # Case 2: multi-step grid with a ragged last block (exercises masked final writeback).
    x2 = jax.random.normal(k_x2, (200, in_features), dtype=jnp.float32)
    out2 = jax.block_until_ready(numerical_embedding_forward(x2, params, block_b=64))
    assert out2.shape == (200, embedding_size)
    ref2_bf16 = reference_forward(x2, params, matmul_dtype=jnp.bfloat16)
    assert jnp.allclose(out2, ref2_bf16, atol=2e-3, rtol=2e-3), "case 2 vs bf16 ref"

    # Case 3: f32 matmul path, checked tightly against the f32 reference.
    out3 = jax.block_until_ready(
        numerical_embedding_forward(x2, params, matmul_dtype=jnp.float32))
    ref3 = reference_forward(x2, params)
    assert jnp.allclose(out3, ref3, atol=1e-4, rtol=1e-4), "case 3 vs f32 ref"

    print("KERNEL_OK")
</pallas_src>

<mosaic_0001>
module attributes {stable_mosaic.version = 11 : i64} {
  func.func @_mlp_kernel(%arg0: i32, %arg1: memref<2x256xf32, #tpu.memory_space<vmem>>, %arg2: memref<256x256xbf16, #tpu.memory_space<vmem>>, %arg3: memref<2x256x256xbf16, #tpu.memory_space<vmem>>, %arg4: memref<3x1x256xf32, #tpu.memory_space<vmem>>, %arg5: memref<2x256xf32, #tpu.memory_space<vmem>>) attributes {dimension_semantics = [#tpu.dimension_semantics<parallel>], iteration_bounds = array<i64: 1>, scalar_prefetch = 0 : i64, scratch_operands = 0 : i64, tpu.core_type = #tpu.core_type<tc>, window_params = [{transform_indices = @transform_0, window_bounds = array<i64: 2, 256>}, {pipeline_mode = #tpu.pipeline_mode<synchronous>, transform_indices = @transform_1, window_bounds = array<i64: 256, 256>}, {pipeline_mode = #tpu.pipeline_mode<synchronous>, transform_indices = @transform_2, window_bounds = array<i64: 2, 256, 256>}, {pipeline_mode = #tpu.pipeline_mode<synchronous>, transform_indices = @transform_3, window_bounds = array<i64: 3, 1, 256>}, {transform_indices = @transform_4, window_bounds = array<i64: 2, 256>}]} {
    %c0 = arith.constant 0 : index
    %c0_0 = arith.constant 0 : index
    %0 = vector.load %arg1[%c0, %c0_0] : memref<2x256xf32, #tpu.memory_space<vmem>>, vector<2x256xf32>
    %1 = arith.truncf %0 : vector<2x256xf32> to vector<2x256xbf16>
    %c0_1 = arith.constant 0 : index
    %c0_2 = arith.constant 0 : index
    %2 = vector.load %arg2[%c0_1, %c0_2] : memref<256x256xbf16, #tpu.memory_space<vmem>>, vector<256x256xbf16>
    %cst = arith.constant dense<0.000000e+00> : vector<2x256xf32>
    %3 = tpu.matmul %1, %2, %cst {dimension_numbers = #tpu.dot_dimension_numbers<[1], [0], [0], [1], [0, 0, 1, 1], [], []>} : vector<2x256xbf16>, vector<256x256xbf16>, vector<2x256xf32> -> vector<2x256xf32>
    %c0_3 = arith.constant 0 : index
    %c0_4 = arith.constant 0 : index
    %c0_5 = arith.constant 0 : index
    %4 = vector.load %arg4[%c0_3, %c0_4, %c0_5] : memref<3x1x256xf32, #tpu.memory_space<vmem>>, vector<1x1x256xf32>
    %5 = vector.shape_cast %4 : vector<1x1x256xf32> to vector<1x256xf32>
    %6 = vector.broadcast %5 : vector<1x256xf32> to vector<2x256xf32>
    %7 = arith.addf %3, %6 : vector<2x256xf32>
    %8 = math.tanh %7 : vector<2x256xf32>
    %9 = arith.truncf %8 : vector<2x256xf32> to vector<2x256xbf16>
    %c0_6 = arith.constant 0 : index
    %c0_7 = arith.constant 0 : index
    %c0_8 = arith.constant 0 : index
    %10 = vector.load %arg3[%c0_6, %c0_7, %c0_8] : memref<2x256x256xbf16, #tpu.memory_space<vmem>>, vector<1x256x256xbf16>
    %11 = vector.shape_cast %10 : vector<1x256x256xbf16> to vector<256x256xbf16>
    %cst_9 = arith.constant dense<0.000000e+00> : vector<2x256xf32>
    %12 = tpu.matmul %9, %11, %cst_9 {dimension_numbers = #tpu.dot_dimension_numbers<[1], [0], [0], [1], [0, 0, 1, 1], [], []>} : vector<2x256xbf16>, vector<256x256xbf16>, vector<2x256xf32> -> vector<2x256xf32>
    %c1 = arith.constant 1 : index
    %c0_10 = arith.constant 0 : index
    %c0_11 = arith.constant 0 : index
    %13 = vector.load %arg4[%c1, %c0_10, %c0_11] : memref<3x1x256xf32, #tpu.memory_space<vmem>>, vector<1x1x256xf32>
    %14 = vector.shape_cast %13 : vector<1x1x256xf32> to vector<1x256xf32>
    %15 = vector.broadcast %14 : vector<1x256xf32> to vector<2x256xf32>
    %16 = arith.addf %12, %15 : vector<2x256xf32>
    %17 = math.tanh %16 : vector<2x256xf32>
    %18 = arith.truncf %17 : vector<2x256xf32> to vector<2x256xbf16>
    %c1_12 = arith.constant 1 : index
    %c0_13 = arith.constant 0 : index
    %c0_14 = arith.constant 0 : index
    %19 = vector.load %arg3[%c1_12, %c0_13, %c0_14] : memref<2x256x256xbf16, #tpu.memory_space<vmem>>, vector<1x256x256xbf16>
    %20 = vector.shape_cast %19 : vector<1x256x256xbf16> to vector<256x256xbf16>
    %cst_15 = arith.constant dense<0.000000e+00> : vector<2x256xf32>
    %21 = tpu.matmul %18, %20, %cst_15 {dimension_numbers = #tpu.dot_dimension_numbers<[1], [0], [0], [1], [0, 0, 1, 1], [], []>} : vector<2x256xbf16>, vector<256x256xbf16>, vector<2x256xf32> -> vector<2x256xf32>
    %c2 = arith.constant 2 : index
    %c0_16 = arith.constant 0 : index
    %c0_17 = arith.constant 0 : index
    %22 = vector.load %arg4[%c2, %c0_16, %c0_17] : memref<3x1x256xf32, #tpu.memory_space<vmem>>, vector<1x1x256xf32>
    %23 = vector.shape_cast %22 : vector<1x1x256xf32> to vector<1x256xf32>
    %24 = vector.broadcast %23 : vector<1x256xf32> to vector<2x256xf32>
    %25 = arith.addf %21, %24 : vector<2x256xf32>
    %26 = math.tanh %25 : vector<2x256xf32>
    %c0_18 = arith.constant 0 : index
    %c0_19 = arith.constant 0 : index
    %27 = vector.load %arg5[%c0_18, %c0_19] : memref<2x256xf32, #tpu.memory_space<vmem>>, vector<2x256xf32>
    tpu.vector_store %arg5[%c0_18, %c0_19], %26 {strides = array<i32>} : memref<2x256xf32, #tpu.memory_space<vmem>>, vector<2x256xf32>,
    return
  }
  func.func @transform_0(%arg0: i32) -> (i32, i32) {
    %c0_i32 = arith.constant 0 : i32
    %c0_i32_0 = arith.constant 0 : i32
    return %arg0, %c0_i32 : i32, i32
  }
  func.func @transform_1(%arg0: i32) -> (i32, i32) {
    %c0_i32 = arith.constant 0 : i32
    %c0_i32_0 = arith.constant 0 : i32
    %c0_i32_1 = arith.constant 0 : i32
    return %c0_i32, %c0_i32_0 : i32, i32
  }
  func.func @transform_2(%arg0: i32) -> (i32, i32, i32) {
    %c0_i32 = arith.constant 0 : i32
    %c0_i32_0 = arith.constant 0 : i32
    %c0_i32_1 = arith.constant 0 : i32
    %c0_i32_2 = arith.constant 0 : i32
    return %c0_i32, %c0_i32_0, %c0_i32_1 : i32, i32, i32
  }
  func.func @transform_3(%arg0: i32) -> (i32, i32, i32) {
    %c0_i32 = arith.constant 0 : i32
    %c0_i32_0 = arith.constant 0 : i32
    %c0_i32_1 = arith.constant 0 : i32
    %c0_i32_2 = arith.constant 0 : i32
    return %c0_i32, %c0_i32_0, %c0_i32_1 : i32, i32, i32
  }
  func.func @transform_4(%arg0: i32) -> (i32, i32) {
    %c0_i32 = arith.constant 0 : i32
    %c0_i32_0 = arith.constant 0 : i32
    return %arg0, %c0_i32 : i32, i32
  }
}

</mosaic_0001>

<bundles_post_ra>
// kernel: _forward_impl.1
= control target key start
LH: loop header
LB: loop body
LE: loop exit
PB: predicated region body
PF: predicated region fallthrough
CT: control target
= control target key end

     0   :  { %s1417_s1 = inlined_call_operand.vmem [shape: bf16[256,256], index: 1, kind: input, shape index: {}]   ;;  %s1418_s0 = inlined_call_operand.vmem [shape: f32[2,256], index: 0, kind: input, shape index: {}]   ;;  %s1419_s2 = inlined_call_operand.vmem [shape: bf16[2,256,256], index: 2, kind: input, shape index: {}]   ;;  %s1420_s3 = inlined_call_operand.vmem [shape: f32[3,1,256], index: 3, kind: input, shape index: {}]   ;;  %s1421_s4 = inlined_call_operand.vmem [shape: f32[2,256], index: 4, kind: output, shape index: {}]  }
   0x1   :  { %v927_v0 = vld [vmem:[%s1417_s1 + $0x74] ss:$8 sps:$4 sm:$0xff]   ;;  %v929_v1 = vld [vmem:[%s1417_s1 + $0x70] ss:$8 sps:$4 sm:$0xff]   ;;  %v930_v2 = vld [vmem:[%s1417_s1 + $0x64] ss:$8 sps:$4 sm:$0xff]  }
   0x2   :  { %235 = vmatprep.subr.bf16.mxu0 %v927_v0  ;;  %v932_v3 = vld [vmem:[%s1417_s1 + $0x60] ss:$8 sps:$4 sm:$0xff]   ;;  %v933_v4 = vld [vmem:[%s1417_s1 + $0x54] ss:$8 sps:$4 sm:$0xff]   ;;  %v935_v5 = vld [vmem:[%s1417_s1 + $0x50] ss:$8 sps:$4 sm:$0xff]  }
   0x3   :  { %236 = vmatpush1.bf16.msra.mxu0 %v929_v1  ;;  %v936_v6 = vld [vmem:[%s1417_s1 + $0x44] ss:$8 sps:$4 sm:$0xff]   ;;  %v938_v7 = vld [vmem:[%s1417_s1 + $0x40] ss:$8 sps:$4 sm:$0xff]   ;;  %v939_v8 = vld [vmem:[%s1417_s1 + $0x34] ss:$8 sps:$4 sm:$0xff]  }
   0x4   :  { %237 = vmatprep.subr.bf16.mxu0 %v930_v2  ;;  %v941_v9 = vld [vmem:[%s1417_s1 + $0x30] ss:$8 sps:$4 sm:$0xff]   ;;  %v942_v10 = vld [vmem:[%s1417_s1 + $0x24] ss:$8 sps:$4 sm:$0xff]   ;;  %v944_v11 = vld [vmem:[%s1417_s1 + $0x20] ss:$8 sps:$4 sm:$0xff]  }
   0x5   :  { %v945_v12 = vld [vmem:[%s1417_s1 + $0x14] ss:$8 sps:$4 sm:$0xff]   ;;  %v947_v13 = vld [vmem:[%s1417_s1 + $0x10] ss:$8 sps:$4 sm:$0xff]   ;;  %v948_v18 = vld [vmem:[%s1417_s1 + $0x4] ss:$8 sps:$4 sm:$0xff]  }
   0x6   :  { %v1153_v14 = vld.sshfl [vmem:[%s1418_s0] sm:$0x33 pattern:$0x76325410]  ;;  %v975_v16 = vld [vmem:[%s1419_s2 + $0x74] ss:$8 sps:$4 sm:$0xff]  }
   0x7   :  { %238 = vmatpush1.bf16.msra.mxu0 %v932_v3  ;;  %v26_v15 = vcombine.high %v1153_v14, %v1153_v14  ;;  %v977_v17 = vld [vmem:[%s1419_s2 + $0x70] ss:$8 sps:$4 sm:$0xff]   ;;  %485 = vmatprep.subr.bf16.mxu1 %v975_v16  ;;  %v978_v20 = vld [vmem:[%s1419_s2 + $0x64] ss:$8 sps:$4 sm:$0xff]   ;;  %v980_v21 = vld [vmem:[%s1419_s2 + $0x60] ss:$8 sps:$4 sm:$0xff]   ;;  %v29_v57 = vpack.c.bf16 %v1153_v14, %v1153_v14 }
   0x8   :  { %239 = vmatprep.subr.bf16.mxu0 %v933_v4  ;;  %486 = vmatpush1.bf16.msra.mxu1 %v977_v17  ;;  %v981_v22 = vld [vmem:[%s1419_s2 + $0x54] ss:$8 sps:$4 sm:$0xff]   ;;  %v950_v23 = vld [vmem:[%s1417_s1] ss:$8 sps:$4 sm:$0xff]   ;;  %v983_v25 = vld [vmem:[%s1419_s2 + $0x50] ss:$8 sps:$4 sm:$0xff]  }
   0x9   :  { %v30_v19 = vpack.c.bf16 %v26_v15, %v26_v15  ;;  %487 = vmatprep.subr.bf16.mxu1 %v978_v20  ;;  %v951_v24 = vld [vmem:[%s1417_s1 + $0xf4] ss:$8 sps:$4 sm:$0xff]   ;;  %v984_v26 = vld [vmem:[%s1419_s2 + $0x44] ss:$8 sps:$4 sm:$0xff]   ;;  %v953_v27 = vld [vmem:[%s1417_s1 + $0xf0] ss:$8 sps:$4 sm:$0xff]  }
   0xa   :  { %v954_v28 = vld [vmem:[%s1417_s1 + $0xe4] ss:$8 sps:$4 sm:$0xff]   ;;  %v986_v29 = vld [vmem:[%s1419_s2 + $0x40] ss:$8 sps:$4 sm:$0xff]   ;;  %v987_v30 = vld [vmem:[%s1419_s2 + $0x34] ss:$8 sps:$4 sm:$0xff]  }
   0xb   :  { %240 = vmatpush1.bf16.msra.mxu0 %v935_v5  ;;  %267 = vmatprep.mubr.bf16.mxu0 %v30_v19  ;;  %v956_v31 = vld [vmem:[%s1417_s1 + $0xe0] ss:$8 sps:$4 sm:$0xff]   ;;  %v957_v32 = vld [vmem:[%s1417_s1 + $0xd4] ss:$8 sps:$4 sm:$0xff]   ;;  %v989_v33 = vld [vmem:[%s1419_s2 + $0x30] ss:$8 sps:$4 sm:$0xff]  }
   0xc   :  { %241 = vmatprep.subr.bf16.mxu0 %v936_v6  ;;  %488 = vmatpush1.bf16.msra.mxu1 %v980_v21  ;;  %v990_v34 = vld [vmem:[%s1419_s2 + $0x24] ss:$8 sps:$4 sm:$0xff]   ;;  %v959_v35 = vld [vmem:[%s1417_s1 + $0xd0] ss:$8 sps:$4 sm:$0xff]   ;;  %v992_v37 = vld [vmem:[%s1419_s2 + $0x20] ss:$8 sps:$4 sm:$0xff]  }
   0xd   :  { %489 = vmatprep.subr.bf16.mxu1 %v981_v22  ;;  %v960_v36 = vld [vmem:[%s1417_s1 + $0xc4] ss:$8 sps:$4 sm:$0xff]   ;;  %v993_v38 = vld [vmem:[%s1419_s2 + $0x14] ss:$8 sps:$4 sm:$0xff]   ;;  %v962_v39 = vld [vmem:[%s1417_s1 + $0xc0] ss:$8 sps:$4 sm:$0xff]  }
   0xe   :  { %v963_v40 = vld [vmem:[%s1417_s1 + $0xb4] ss:$8 sps:$4 sm:$0xff]   ;;  %v995_v41 = vld [vmem:[%s1419_s2 + $0x10] ss:$8 sps:$4 sm:$0xff]   ;;  %v996_v42 = vld [vmem:[%s1419_s2 + $0x4] ss:$8 sps:$4 sm:$0xff]  }
   0xf   :  { %242 = vmatpush1.bf16.msra.mxu0 %v938_v7  ;;  %v965_v43 = vld [vmem:[%s1417_s1 + $0xb0] ss:$8 sps:$4 sm:$0xff]   ;;  %v966_v44 = vld [vmem:[%s1417_s1 + $0xa4] ss:$8 sps:$4 sm:$0xff]   ;;  %v998_v45 = vld [vmem:[%s1419_s2] ss:$8 sps:$4 sm:$0xff]  }
  0x10   :  { %243 = vmatprep.subr.bf16.mxu0 %v939_v8  ;;  %490 = vmatpush1.bf16.msra.mxu1 %v983_v25  ;;  %v999_v46 = vld [vmem:[%s1419_s2 + $0xf4] ss:$8 sps:$4 sm:$0xff]   ;;  %v968_v47 = vld [vmem:[%s1417_s1 + $0xa0] ss:$8 sps:$4 sm:$0xff]   ;;  %v1001_v49 = vld [vmem:[%s1419_s2 + $0xf0] ss:$8 sps:$4 sm:$0xff]  }
  0x11   :  { %491 = vmatprep.subr.bf16.mxu1 %v984_v26  ;;  %v969_v48 = vld [vmem:[%s1417_s1 + $0x94] ss:$8 sps:$4 sm:$0xff]   ;;  %v1002_v50 = vld [vmem:[%s1419_s2 + $0xe4] ss:$8 sps:$4 sm:$0xff]   ;;  %v971_v51 = vld [vmem:[%s1417_s1 + $0x90] ss:$8 sps:$4 sm:$0xff]   ;;  %v65_v26 = vlaneseq }
  0x12   :  { %v972_v52 = vld [vmem:[%s1417_s1 + $0x84] ss:$8 sps:$4 sm:$0xff]   ;;  %v1004_v53 = vld [vmem:[%s1419_s2 + $0xe0] ss:$8 sps:$4 sm:$0xff]   ;;  %v1005_v54 = vld [vmem:[%s1419_s2 + $0xd4] ss:$8 sps:$4 sm:$0xff]  }
  0x13   :  { %244 = vmatpush1.bf16.msra.mxu0 %v941_v9  ;;  %v974_v55 = vld [vmem:[%s1417_s1 + $0x80] ss:$8 sps:$4 sm:$0xff]   ;;  %v1007_v56 = vld [vmem:[%s1419_s2 + $0xd0] ss:$8 sps:$4 sm:$0xff]   ;;  %v1008_v58 = vld [vmem:[%s1419_s2 + $0xc4] ss:$8 sps:$4 sm:$0xff]  }
  0x14   :  { %245 = vmatprep.subr.bf16.mxu0 %v942_v10  ;;  %492 = vmatpush1.bf16.msra.mxu1 %v986_v29  ;;  %v1010_v59 = vld [vmem:[%s1419_s2 + $0xc0] ss:$8 sps:$4 sm:$0xff]   ;;  %v1011_v60 = vld [vmem:[%s1419_s2 + $0xb4] ss:$8 sps:$4 sm:$0xff]   ;;  %v1013_v61 = vld [vmem:[%s1419_s2 + $0xb0] ss:$8 sps:$4 sm:$0xff]  }
  0x15   :  { %493 = vmatprep.subr.bf16.mxu1 %v987_v30  ;;  %v1014_v62 = vld [vmem:[%s1419_s2 + $0xa4] ss:$8 sps:$4 sm:$0xff]   ;;  %v1016_v63 = vld [vmem:[%s1419_s2 + $0xa0] ss:$8 sps:$4 sm:$0xff]   ;;  %v1017_v0 = vld [vmem:[%s1419_s2 + $0x94] ss:$8 sps:$4 sm:$0xff]  }
  0x16   :  { %v1019_v1 = vld [vmem:[%s1419_s2 + $0x90] ss:$8 sps:$4 sm:$0xff]   ;;  %v1020_v2 = vld [vmem:[%s1419_s2 + $0x84] ss:$8 sps:$4 sm:$0xff]   ;;  %v1022_v3 = vld [vmem:[%s1419_s2 + $0x80] ss:$8 sps:$4 sm:$0xff]  }
  0x17   :  { %246 = vmatpush1.bf16.msra.mxu0 %v944_v11  ;;  %v1023_v4 = vld [vmem:[%s1419_s2 + $0x170] ss:$8 sps:$4 sm:$0xff]   ;;  %v1025_v5 = vld [vmem:[%s1419_s2 + $0x174] ss:$8 sps:$4 sm:$0xff]   ;;  %v1028_v6 = vld [vmem:[%s1419_s2 + $0x164] ss:$8 sps:$4 sm:$0xff]  }
  0x18   :  { %247 = vmatprep.subr.bf16.mxu0 %v945_v12  ;;  %494 = vmatpush1.bf16.msra.mxu1 %v989_v33  ;;  %v1026_v7 = vld [vmem:[%s1419_s2 + $0x160] ss:$8 sps:$4 sm:$0xff]   ;;  %v1031_v8 = vld [vmem:[%s1419_s2 + $0x154] ss:$8 sps:$4 sm:$0xff]   ;;  %v1029_v9 = vld [vmem:[%s1419_s2 + $0x150] ss:$8 sps:$4 sm:$0xff]  }
  0x19   :  { %495 = vmatprep.subr.bf16.mxu1 %v990_v34  ;;  %v1034_v10 = vld [vmem:[%s1419_s2 + $0x144] ss:$8 sps:$4 sm:$0xff]   ;;  %v1032_v11 = vld [vmem:[%s1419_s2 + $0x140] ss:$8 sps:$4 sm:$0xff]   ;;  %v1037_v12 = vld [vmem:[%s1419_s2 + $0x134] ss:$8 sps:$4 sm:$0xff]  }
  0x1a   :  { %v1040_v14 = vld [vmem:[%s1419_s2 + $0x124] ss:$8 sps:$4 sm:$0xff]   ;;  %v1038_v15 = vld [vmem:[%s1419_s2 + $0x120] ss:$8 sps:$4 sm:$0xff]   ;;  %v1043_v16 = vld [vmem:[%s1419_s2 + $0x114] ss:$8 sps:$4 sm:$0xff]  }
  0x1b   :  { %248 = vmatpush1.bf16.msra.mxu0 %v947_v13  ;;  %v1035_v13 = vld [vmem:[%s1419_s2 + $0x130] ss:$8 sps:$4 sm:$0xff]   ;;  %v1044_v19 = vld [vmem:[%s1419_s2 + $0x100] ss:$8 sps:$4 sm:$0xff]   ;;  %v1049_v20 = vld [vmem:[%s1419_s2 + $0x1f4] ss:$8 sps:$4 sm:$0xff]  }
  0x1c   :  { %249 = vmatprep.subr.bf16.mxu0 %v948_v18  ;;  %496 = vmatpush1.bf16.msra.mxu1 %v992_v37  ;;  %v1041_v17 = vld [vmem:[%s1419_s2 + $0x110] ss:$8 sps:$4 sm:$0xff]   ;;  %v1046_v18 = vld [vmem:[%s1419_s2 + $0x104] ss:$8 sps:$4 sm:$0xff]   ;;  %v63_v29 = vld [vmem:[%s1420_s3] sm:$0x3] }
  0x1d   :  { %497 = vmatprep.subr.bf16.mxu1 %v993_v38  ;;  %v1047_v21 = vld [vmem:[%s1419_s2 + $0x1f0] ss:$8 sps:$4 sm:$0xff]   ;;  %v1052_v22 = vld [vmem:[%s1419_s2 + $0x1e4] ss:$8 sps:$4 sm:$0xff]  }
  0x1e   :  { %v1053_v25 = vld [vmem:[%s1419_s2 + $0x1d0] ss:$8 sps:$4 sm:$0xff]  }
  0x1f   :  { %250 = vmatpush1.bf16.msra.mxu0 %v950_v23  ;;  %v1050_v23 = vld [vmem:[%s1419_s2 + $0x1e0] ss:$8 sps:$4 sm:$0xff]  }
  0x20   :  { %251 = vmatprep.subr.bf16.mxu0 %v951_v24  ;;  %498 = vmatpush1.bf16.msra.mxu1 %v995_v41  ;;  %v1055_v24 = vld [vmem:[%s1419_s2 + $0x1d4] ss:$8 sps:$4 sm:$0xff]  }
  0x21   :  { %499 = vmatprep.subr.bf16.mxu1 %v996_v42 }
  0x23   :  { %252 = vmatpush2.bf16.msra.mxu0 %v953_v27  ;;  %v66_v27 = vshrl.u32 %v65_v26, 7 }
  0x24   :  { %253 = vmatprep.subr.bf16.mxu0 %v954_v28  ;;  %500 = vmatpush1.bf16.msra.mxu1 %v998_v45  ;;  %v1061_v45 = vld [vmem:[%s1419_s2 + $0x1b4] ss:$8 sps:$4 sm:$0xff]  }
  0x25   :  { %501 = vmatprep.subr.bf16.mxu1 %v999_v46  ;;  %v67_v28 = vsub.s32 0, %v66_v27  ;;  %v71_v30 = vsub.s32 1, %v66_v27  ;;  %v1059_v46 = vld [vmem:[%s1419_s2 + $0x1b0] ss:$8 sps:$4 sm:$0xff]  }
  0x27   :  { %254 = vmatpush2.bf16.msra.mxu0 %v956_v31  ;;  %v68_v31 = vrot.slane %v63_v29, %v67_v28 }
  0x28   :  { %255 = vmatprep.subr.bf16.mxu0 %v957_v32  ;;  %502 = vmatpush2.bf16.msra.mxu1 %v1001_v49  ;;  %v72_v32 = vrot.slane %v63_v29, %v71_v30  ;;  %v1067_v49 = vld [vmem:[%s1419_s2 + $0x194] ss:$8 sps:$4 sm:$0xff]  }
  0x29   :  { %503 = vmatprep.subr.bf16.mxu1 %v1002_v50  ;;  %v1065_v50 = vld [vmem:[%s1419_s2 + $0x190] ss:$8 sps:$4 sm:$0xff]  }
  0x2b   :  { %256 = vmatpush2.bf16.msra.mxu0 %v959_v35 }
  0x2c   :  { %257 = vmatprep.subr.bf16.mxu0 %v960_v36  ;;  %504 = vmatpush2.bf16.msra.mxu1 %v1004_v53  ;;  %v828_v53 = vld [vmem:[%s1420_s3 + $0x2] sm:$0x3] }
  0x2d   :  { %505 = vmatprep.subr.bf16.mxu1 %v1005_v54  ;;  %v318_v54 = vrot.slane %v828_v53, %v67_v28 }
  0x2f   :  { %258 = vmatpush2.bf16.msra.mxu0 %v962_v39 }
  0x30   :  { %259 = vmatprep.subr.bf16.mxu0 %v963_v40  ;;  %506 = vmatpush2.bf16.msra.mxu1 %v1007_v56 }
  0x31   :  { %507 = vmatprep.subr.bf16.mxu1 %v1008_v58 }
  0x33   :  { %260 = vmatpush2.bf16.msra.mxu0 %v965_v43  ;;  %v1058_v43 = vld [vmem:[%s1419_s2 + $0x1c4] ss:$8 sps:$4 sm:$0xff]  }
  0x34   :  { %261 = vmatprep.subr.bf16.mxu0 %v966_v44  ;;  %508 = vmatpush2.bf16.msra.mxu1 %v1010_v59  ;;  %v1056_v44 = vld [vmem:[%s1419_s2 + $0x1c0] ss:$8 sps:$4 sm:$0xff]  }
  0x35   :  { %509 = vmatprep.subr.bf16.mxu1 %v1011_v60 }
  0x37   :  { %262 = vmatpush2.bf16.msra.mxu0 %v968_v47  ;;  %v1064_v47 = vld [vmem:[%s1419_s2 + $0x1a4] ss:$8 sps:$4 sm:$0xff]  }
  0x38   :  { %263 = vmatprep.subr.bf16.mxu0 %v969_v48  ;;  %510 = vmatpush2.bf16.msra.mxu1 %v1013_v61  ;;  %v1062_v48 = vld [vmem:[%s1419_s2 + $0x1a0] ss:$8 sps:$4 sm:$0xff]  }
  0x39   :  { %511 = vmatprep.subr.bf16.mxu1 %v1014_v62 }
  0x3b   :  { %264 = vmatpush2.bf16.msra.mxu0 %v971_v51  ;;  %v1070_v51 = vld [vmem:[%s1419_s2 + $0x184] ss:$8 sps:$4 sm:$0xff]  }
  0x3c   :  { %265 = vmatprep.subr.bf16.mxu0 %v972_v52  ;;  %512 = vmatpush2.bf16.msra.mxu1 %v1016_v63  ;;  %v1068_v52 = vld [vmem:[%s1419_s2 + $0x180] ss:$8 sps:$4 sm:$0xff]  }
  0x3d   :  { %513 = vmatprep.subr.bf16.mxu1 %v1017_v0 }
  0x3f   :  { %266 = vmatpush2.bf16.msra.mxu0 %v974_v55  ;;  %v322_v55 = vrot.slane %v828_v53, %v71_v30 }
  0x40   :  { %514 = vmatpush2.bf16.msra.mxu1 %v1019_v1  ;;  %736 = vmatprep.subr.bf16.mxu0 %v1025_v5 }
  0x41   :  { %515 = vmatprep.subr.bf16.mxu1 %v1020_v2  ;;  %v893_v2 = vld [vmem:[%s1420_s3 + $0x4] sm:$0x3] }
  0x42   :  { %268 = vmatmul.mubr.bf16.vlgmr.msra.gmra.mxu0 %v29_v57 }
  0x43   :  { %737 = vmatpush1.bf16.msra.mxu0 %v1023_v4  ;;  %v573_v4 = vrot.slane %v893_v2, %v71_v30 }
  0x44   :  { %516 = vmatpush2.bf16.msra.mxu1 %v1022_v3  ;;  %738 = vmatprep.subr.bf16.mxu0 %v1028_v6  ;;  %v569_v3 = vrot.slane %v893_v2, %v67_v28 }
  0x47   :  { %739 = vmatpush1.bf16.msra.mxu0 %v1026_v7 }
  0x48   :  { %740 = vmatprep.subr.bf16.mxu0 %v1031_v8 }
  0x4b   :  { %741 = vmatpush1.bf16.msra.mxu0 %v1029_v9 }
  0x4c   :  { %742 = vmatprep.subr.bf16.mxu0 %v1034_v10 }
  0x4f   :  { %743 = vmatpush1.bf16.msra.mxu0 %v1032_v11 }
  0x50   :  { %744 = vmatprep.subr.bf16.mxu0 %v1037_v12 }
  0x53   :  { %745 = vmatpush1.bf16.msra.mxu0 %v1035_v13 }
  0x54   :  { %746 = vmatprep.subr.bf16.mxu0 %v1040_v14 }
  0x57   :  { %747 = vmatpush1.bf16.msra.mxu0 %v1038_v15 }
  0x58   :  { %748 = vmatprep.subr.bf16.mxu0 %v1043_v16 }
  0x5b   :  { %749 = vmatpush1.bf16.msra.mxu0 %v1041_v17 }
  0x5c   :  { %750 = vmatprep.subr.bf16.mxu0 %v1046_v18 }
  0x5f   :  { %751 = vmatpush1.bf16.msra.mxu0 %v1044_v19 }
  0x60   :  { %752 = vmatprep.subr.bf16.mxu0 %v1049_v20 }
  0x63   :  { %753 = vmatpush2.bf16.msra.mxu0 %v1047_v21 }
  0x64   :  { %754 = vmatprep.subr.bf16.mxu0 %v1052_v22 }
  0x67   :  { %755 = vmatpush2.bf16.msra.mxu0 %v1050_v23 }
  0x68   :  { %756 = vmatprep.subr.bf16.mxu0 %v1055_v24 }
  0x6b   :  { %757 = vmatpush2.bf16.msra.mxu0 %v1053_v25 }
  0x6c   :  { %758 = vmatprep.subr.bf16.mxu0 %v1058_v43 }
  0x6f   :  { %759 = vmatpush2.bf16.msra.mxu0 %v1056_v44 }
  0x70   :  { %760 = vmatprep.subr.bf16.mxu0 %v1061_v45 }
  0x73   :  { %761 = vmatpush2.bf16.msra.mxu0 %v1059_v46 }
  0x74   :  { %762 = vmatprep.subr.bf16.mxu0 %v1064_v47 }
  0x77   :  { %763 = vmatpush2.bf16.msra.mxu0 %v1062_v48 }
  0x78   :  { %764 = vmatprep.subr.bf16.mxu0 %v1067_v49 }
  0x7b   :  { %765 = vmatpush2.bf16.msra.mxu0 %v1065_v50 }
  0x7c   :  { %766 = vmatprep.subr.bf16.mxu0 %v1070_v51 }
  0x7f   :  { %767 = vmatpush2.bf16.msra.mxu0 %v1068_v52 }
 0x102   :  { %v269_v33 = vpop.f32.mrf.mxu0 }
 0x103   :  { %v270_v34 = vadd.f32 %v269_v33, %v68_v31 }
 0x104   :  { %v271_v35 = vpop.f32.mrf.mxu0 }
 0x105   :  { %v272_v36 = vadd.f32 %v271_v35, %v72_v32  ;;  %1071 = vtanh.f32 %v270_v34 }
 0x106   :  { %v273_v37 = vpop.f32.mrf.mxu0 }
 0x107   :  { %1073 = vtanh.f32 %v272_v36 }
 0x108   :  { %v274_v38 = vpop.f32.mrf.mxu0 }
 0x112   :  { %v1072_v39 = vpop.eup %1071 }
 0x113   :  { %v278_v42 = vpack.c.bf16 %v1072_v39, %v1072_v39 }
 0x114   :  { %v1074_v40 = vpop.eup %1073 }
 0x115   :  { %v279_v41 = vpack.c.bf16 %v1074_v40, %v1074_v40 }
 0x117   :  { %517 = vmatprep.mubr.bf16.mxu1 %v279_v41 }
 0x118   :  { %518 = vmatmul.mubr.bf16.vlgmr.msra.gmra.mxu1 %v278_v42 }
 0x1d8   :  { %v519_v56 = vpop.f32.mrf.mxu1 }
 0x1d9   :  { %v520_v57 = vadd.f32 %v519_v56, %v318_v54 }
 0x1da   :  { %v521_v58 = vpop.f32.mrf.mxu1 }
 0x1db   :  { %v522_v59 = vadd.f32 %v521_v58, %v322_v55  ;;  %1075 = vtanh.f32 %v520_v57 }
 0x1dc   :  { %v523_v60 = vpop.f32.mrf.mxu1 }
 0x1dd   :  { %1077 = vtanh.f32 %v522_v59 }
 0x1de   :  { %v524_v61 = vpop.f32.mrf.mxu1 }
 0x1e8   :  { %v1076_v62 = vpop.eup %1075 }
 0x1e9   :  { %v528_v1 = vpack.c.bf16 %v1076_v62, %v1076_v62 }
 0x1ea   :  { %v1078_v63 = vpop.eup %1077 }
 0x1eb   :  { %v529_v0 = vpack.c.bf16 %v1078_v63, %v1078_v63 }
 0x1ed   :  { %768 = vmatprep.mubr.bf16.mxu0 %v529_v0 }
 0x1ee   :  { %769 = vmatmul.mubr.bf16.vlgmr.msra.gmra.mxu0 %v528_v1 }
 0x2ae   :  { %v770_v5 = vpop.f32.mrf.mxu0 }
 0x2af   :  { %v771_v6 = vadd.f32 %v770_v5, %v569_v3 }
 0x2b0   :  { %v772_v7 = vpop.f32.mrf.mxu0 }
 0x2b1   :  { %v773_v8 = vadd.f32 %v772_v7, %v573_v4  ;;  %1079 = vtanh.f32 %v771_v6 }
 0x2b2   :  { %v774_v9 = vpop.f32.mrf.mxu0 }
 0x2b3   :  { %1081 = vtanh.f32 %v773_v8 }
 0x2b4   :  { %v775_v10 = vpop.f32.mrf.mxu0 }
 0x2be   :  { %v1080_v11 = vpop.eup %1079 }
 0x2c0   :  { %v1082_v12 = vpop.eup %1081 }
 0x2c1   :  { %v781_v13 = vcombine.low %v1080_v11, %v1082_v12 }
 0x2c3   :  { %926 = vst.sshfl [vmem:[%s1421_s4] sm:$0x33 pattern:$0x76325410] %v781_v13 }

</bundles_post_ra>
